<compile_context>
chip_gen: v6e
topology: v6e:2x2x1
jax: 0.10.0
libtpu: 0.0.40
codegen_flags: <defaults>
</compile_context>

<pallas_src>
import functools

import jax
import jax.numpy as jnp
from jax.experimental import pallas as pl
from jax.experimental.pallas import tpu as pltpu


# ---------------------------------------------------------------------------
# Single-pass fused kernel: mean -> FC1 -> PReLU -> FC2 -> sigmoid -> scale,
# operating on one (Bt, C, L) batch slab per grid step.
# ---------------------------------------------------------------------------
def _se_fused_kernel(x_ref, w1t_ref, b1_ref, a_ref, w2t_ref, b2_ref, o_ref):
    # x_ref  : (Bt, C, L) VMEM    w1t_ref: (C, H)  VMEM (pre-transposed)
    # b1_ref : (1, H)     VMEM    a_ref  : (1, 1)  SMEM (PReLU shared slope)
    # w2t_ref: (H, C)     VMEM    b2_ref : (1, C)  VMEM
    # o_ref  : (Bt, C, L) VMEM
    L = x_ref.shape[-1]

    # AdaptiveAvgPool1d(1): mean over L, accumulated in f32 (no f32 slab copy).
    y = jnp.sum(x_ref[...], axis=-1, dtype=jnp.float32) / L            # (Bt, C)

    # fc[0]: Linear(C -> H); fc[1]: PReLU (single learnable slope).
    h = jnp.dot(y, w1t_ref[...], preferred_element_type=jnp.float32) + b1_ref[...]
    a = a_ref[0, 0]
    h = jnp.where(h >= 0, h, a * h)

    # fc[2]: Linear(H -> C); fc[3]: Sigmoid.
    s = jax.nn.sigmoid(
        jnp.dot(h, w2t_ref[...], preferred_element_type=jnp.float32) + b2_ref[...]
    )                                                                   # (Bt, C)

    # out = x * s: re-read x_ref here (short live range of the big slab),
    # multiply in f32, cast the product to the output dtype.
    o_ref[...] = (x_ref[...].astype(jnp.float32) * s[:, :, None]).astype(o_ref.dtype)


# ---------------------------------------------------------------------------
# Two-pass fallback, pass 1: L-chunked mean accumulation.
# ---------------------------------------------------------------------------
def _se_mean_kernel(x_ref, mean_ref, acc_ref, *, L, tL):
    # x_ref: (1, C, tL) ; mean_ref: (1, 1, C) f32 ; acc_ref: (1, C) f32 scratch
    k = pl.program_id(1)

    @pl.when(k == 0)
    def _():
        acc_ref[...] = jnp.zeros_like(acc_ref)

    # Mask the (possibly) partial last L-chunk.
    lane = jax.lax.broadcasted_iota(jnp.int32, x_ref.shape, dimension=2)
    valid = lane < (L - k * tL)
    xs = jnp.where(valid, x_ref[...].astype(jnp.float32), 0.0)
    acc_ref[...] += jnp.sum(xs, axis=-1)                                # (1, C)

    @pl.when(k == pl.num_programs(1) - 1)
    def _():
        mean_ref[...] = (acc_ref[...] / L).reshape(mean_ref.shape)      # (1, 1, C)


# ---------------------------------------------------------------------------
# Two-pass fallback, pass 2: L-chunked scale.
# ---------------------------------------------------------------------------
def _se_scale_kernel(x_ref, s_ref, o_ref):
    # x_ref: (1, C, tL) ; s_ref: (1, C, 1) f32 ; o_ref: (1, C, tL)
    o_ref[...] = (x_ref[...].astype(jnp.float32) * s_ref[...]).astype(o_ref.dtype)


def _vmem_budget_bytes():
    """Generation-aware VMEM budget: ~3/4 of physical (96 MiB v5e/v6e, 48 MiB v7x)."""
    try:
        cap = int(pltpu.get_tpu_info().vmem_capacity_bytes)
    except Exception:
        cap = 64 * 1024 * 1024  # conservative (v7x-sized) fallback
    return cap * 3 // 4


def se_layer(x, w1, b1, prelu_a, w2, b2, *, donate_x=False, force_two_pass=False):
    """x: (B, C, L); w1: (H, C); b1: (1, H); prelu_a: (1, 1); w2: (C, H); b2: (1, C)."""
    B, C, L = x.shape
    H = w1.shape[0]

    # Pre-transpose Linear weights once at trace time (PyTorch stores (out, in)).
    w1t = w1.T  # (C, H)
    w2t = w2.T  # (H, C)

    itemsize = jnp.dtype(x.dtype).itemsize
    p_itemsize = jnp.dtype(w1.dtype).itemsize
    param_bytes = (w1t.size + w2t.size + b1.size + b2.size) * p_itemsize

    budget = _vmem_budget_bytes()
    # Bytes available for the double-buffered (in + out) x slabs, minus resident
    # weights and a little compiler headroom.
    slab_budget = max(budget - 2 * param_bytes - (1 << 20), budget // 2)
    row_bytes = C * L * itemsize  # one batch row, in OR out

    # Largest batch tile keeping 2x(in slab) + 2x(out slab) inside the budget.
    bt_vmem = slab_budget // (4 * row_bytes)

    io_alias = {0: 0} if donate_x else {}

    if bt_vmem >= 1 and not force_two_pass:
        # -------- Single-pass fused path (lower HBM traffic: ~2*B*C*L bytes). ----
        # Cap Bt at ~B/4 so the grid keeps >= ~4 steps (v7x megacore + pipelining).
        bt = int(max(1, min(bt_vmem, max(1, B // 4), B)))
        grid_b = pl.cdiv(B, bt)

        cost = pl.CostEstimate(
            flops=2 * B * C * L + 4 * B * C * H,
            transcendentals=B * C,  # sigmoid
            bytes_accessed=2 * B * C * L * itemsize + param_bytes,
        )

        return pl.pallas_call(
            _se_fused_kernel,
            out_shape=jax.ShapeDtypeStruct((B, C, L), x.dtype),
            grid=(grid_b,),
            in_specs=[
                pl.BlockSpec((bt, C, L), lambda b: (b, 0, 0)),            # x slab
                pl.BlockSpec((C, H), lambda b: (0, 0)),                   # w1^T (resident)
                pl.BlockSpec((1, H), lambda b: (0, 0)),                   # b1
                pl.BlockSpec((1, 1), lambda b: (0, 0),
                             memory_space=pltpu.MemorySpace.SMEM),        # PReLU slope
                pl.BlockSpec((H, C), lambda b: (0, 0)),                   # w2^T (resident)
                pl.BlockSpec((1, C), lambda b: (0, 0)),                   # b2
            ],
            out_specs=pl.BlockSpec((bt, C, L), lambda b: (b, 0, 0)),
            compiler_params=pltpu.CompilerParams(
                dimension_semantics=("parallel",),
                vmem_limit_bytes=budget,
            ),
            cost_estimate=cost,
            input_output_aliases=io_alias,
        )(x, w1t, b1, prelu_a, w2t, b2)

    # -------- Two-pass fallback (slab too big for VMEM, e.g. huge L on v7x). ----
    # tL: full L if it fits, otherwise the largest multiple of 128 that fits.
    max_chunk_elems = max(slab_budget // (4 * C * itemsize), 128)
    if L <= max_chunk_elems:
        tL = L
    else:
        tL = max((max_chunk_elems // 128) * 128, 128)
    n_l = pl.cdiv(L, tL)

    # Pass 1: per-(batch, L-chunk) mean accumulation -> (B, 1, C) f32 means.
    means = pl.pallas_call(
        functools.partial(_se_mean_kernel, L=L, tL=tL),
        out_shape=jax.ShapeDtypeStruct((B, 1, C), jnp.float32),
        grid=(B, n_l),
        in_specs=[pl.BlockSpec((1, C, tL), lambda b, k: (b, 0, k))],
        out_specs=pl.BlockSpec((1, 1, C), lambda b, k: (b, 0, 0)),
        scratch_shapes=[pltpu.VMEM((1, C), jnp.float32)],
        compiler_params=pltpu.CompilerParams(
            dimension_semantics=("parallel", "arbitrary"),
            vmem_limit_bytes=budget,
        ),
        cost_estimate=pl.CostEstimate(
            flops=B * C * L,
            transcendentals=0,
            bytes_accessed=B * C * L * itemsize + B * C * 4,
        ),
    )(x)

    # Tiny FC + PReLU + FC + sigmoid in plain JAX (negligible vs. HBM traffic).
    y = means.reshape(B, C)
    h = y @ w1t.astype(jnp.float32) + b1.astype(jnp.float32)
    a = prelu_a.astype(jnp.float32)[0, 0]
    h = jnp.where(h >= 0, h, a * h)
    s = jax.nn.sigmoid(h @ w2t.astype(jnp.float32) + b2.astype(jnp.float32))
    s = s.reshape(B, C, 1)

    # Pass 2: per-(batch, L-chunk) scale.
    return pl.pallas_call(
        _se_scale_kernel,
        out_shape=jax.ShapeDtypeStruct((B, C, L), x.dtype),
        grid=(B, n_l),
        in_specs=[
            pl.BlockSpec((1, C, tL), lambda b, k: (b, 0, k)),
            pl.BlockSpec((1, C, 1), lambda b, k: (b, 0, 0)),
        ],
        out_specs=pl.BlockSpec((1, C, tL), lambda b, k: (b, 0, k)),
        compiler_params=pltpu.CompilerParams(
            dimension_semantics=("parallel", "parallel"),
            vmem_limit_bytes=budget,
        ),
        cost_estimate=pl.CostEstimate(
            flops=B * C * L,
            transcendentals=0,
            bytes_accessed=2 * B * C * L * itemsize + B * C * 4,
        ),
        input_output_aliases=io_alias,
    )(x, s)


def se_layer_ref(x, w1, b1, prelu_a, w2, b2):
    """Pure-JAX reference mirroring the PyTorch forward."""
    y = jnp.mean(x.astype(jnp.float32), axis=-1)  # (B, C)
    h = y @ w1.T + b1[0]
    a = prelu_a[0, 0]
    h = jnp.where(h >= 0, h, a * h)
    s = jax.nn.sigmoid(h @ w2.T + b2[0])
    return (x.astype(jnp.float32) * s[:, :, None]).astype(x.dtype)


if __name__ == "__main__":
    B, C, L, H = 2, 4, 16, 32  # _in = C = 4, _hidden = 32

    key = jax.random.PRNGKey(0)
    kx, kw1, kb1, kw2, kb2 = jax.random.split(key, 5)

    x = jax.random.normal(kx, (B, C, L), dtype=jnp.float32)

    # Deterministic parameter init (PyTorch Linear-style uniform bounds).
    bound1 = 1.0 / (C ** 0.5)
    w1 = jax.random.uniform(kw1, (H, C), jnp.float32, -bound1, bound1)
    b1 = jax.random.uniform(kb1, (1, H), jnp.float32, -bound1, bound1)
    bound2 = 1.0 / (H ** 0.5)
    w2 = jax.random.uniform(kw2, (C, H), jnp.float32, -bound2, bound2)
    b2 = jax.random.uniform(kb2, (1, C), jnp.float32, -bound2, bound2)
    prelu_a = jnp.full((1, 1), 0.25, dtype=jnp.float32)  # PReLU default init

    ref = se_layer_ref(x, w1, b1, prelu_a, w2, b2)

    # Default (single-pass fused) path.
    out = jax.block_until_ready(se_layer(x, w1, b1, prelu_a, w2, b2))
    assert out.shape == (B, C, L)
    assert jnp.allclose(out, ref, rtol=1e-5, atol=1e-5), "single-pass mismatch vs reference"

    # Two-pass fallback path (exercised explicitly so the v7x large-L path is tested).
    out2 = jax.block_until_ready(
        se_layer(x, w1, b1, prelu_a, w2, b2, force_two_pass=True)
    )
    assert jnp.allclose(out2, ref, rtol=1e-5, atol=1e-5), "two-pass mismatch vs reference"

    print("KERNEL_OK")
</pallas_src>

<mosaic_0001>
module attributes {stable_mosaic.version = 11 : i64} {
  func.func @_se_fused_kernel(%arg0: i32, %arg1: memref<1x4x16xf32, #tpu.memory_space<vmem>>, %arg2: memref<4x32xf32, #tpu.memory_space<vmem>>, %arg3: memref<1x32xf32, #tpu.memory_space<vmem>>, %arg4: memref<1x1xf32, #tpu.memory_space<smem>>, %arg5: memref<32x4xf32, #tpu.memory_space<vmem>>, %arg6: memref<1x4xf32, #tpu.memory_space<vmem>>, %arg7: memref<1x4x16xf32, #tpu.memory_space<vmem>>) attributes {dimension_semantics = [#tpu.dimension_semantics<parallel>], iteration_bounds = array<i64: 2>, scalar_prefetch = 0 : i64, scratch_operands = 0 : i64, tpu.core_type = #tpu.core_type<tc>, window_params = [{transform_indices = @transform_0, window_bounds = array<i64: 1, 4, 16>}, {pipeline_mode = #tpu.pipeline_mode<synchronous>, transform_indices = @transform_1, window_bounds = array<i64: 4, 32>}, {pipeline_mode = #tpu.pipeline_mode<synchronous>, transform_indices = @transform_2, window_bounds = array<i64: 1, 32>}, {transform_indices = @transform_3, window_bounds = array<i64: 1, 1>}, {pipeline_mode = #tpu.pipeline_mode<synchronous>, transform_indices = @transform_4, window_bounds = array<i64: 32, 4>}, {pipeline_mode = #tpu.pipeline_mode<synchronous>, transform_indices = @transform_5, window_bounds = array<i64: 1, 4>}, {transform_indices = @transform_6, window_bounds = array<i64: 1, 4, 16>}]} {
    %c0 = arith.constant 0 : index
    %c0_0 = arith.constant 0 : index
    %c0_1 = arith.constant 0 : index
    %0 = vector.load %arg1[%c0, %c0_0, %c0_1] : memref<1x4x16xf32, #tpu.memory_space<vmem>>, vector<1x4x16xf32>
    %cst = arith.constant dense<0.000000e+00> : vector<1x4xf32>
    %1 = vector.multi_reduction <add>, %0, %cst [2] : vector<1x4x16xf32> to vector<1x4xf32>
    %cst_2 = arith.constant 1.600000e+01 : f32
    %2 = vector.broadcast %cst_2 : f32 to vector<1x4xf32>
    %3 = arith.divf %1, %2 : vector<1x4xf32>
    %c0_3 = arith.constant 0 : index
    %c0_4 = arith.constant 0 : index
    %4 = vector.load %arg2[%c0_3, %c0_4] : memref<4x32xf32, #tpu.memory_space<vmem>>, vector<4x32xf32>
    %cst_5 = arith.constant dense<0.000000e+00> : vector<1x32xf32>
    %5 = tpu.matmul %3, %4, %cst_5 {dimension_numbers = #tpu.dot_dimension_numbers<[1], [0], [0], [1], [0, 0, 1, 1], [], []>} : vector<1x4xf32>, vector<4x32xf32>, vector<1x32xf32> -> vector<1x32xf32>
    %c0_6 = arith.constant 0 : index
    %c0_7 = arith.constant 0 : index
    %6 = vector.load %arg3[%c0_6, %c0_7] : memref<1x32xf32, #tpu.memory_space<vmem>>, vector<1x32xf32>
    %7 = arith.addf %5, %6 : vector<1x32xf32>
    %c0_8 = arith.constant 0 : index
    %c0_9 = arith.constant 0 : index
    %8 = memref.load %arg4[%c0_8, %c0_9] : memref<1x1xf32, #tpu.memory_space<smem>>
    %cst_10 = arith.constant 0.000000e+00 : f32
    %9 = vector.broadcast %cst_10 : f32 to vector<1x32xf32>
    %10 = arith.cmpf oge, %7, %9 : vector<1x32xf32>
    %11 = vector.broadcast %8 : f32 to vector<1x32xf32>
    %12 = arith.mulf %11, %7 : vector<1x32xf32>
    %13 = arith.select %10, %7, %12 : vector<1x32xi1>, vector<1x32xf32>
    %c0_11 = arith.constant 0 : index
    %c0_12 = arith.constant 0 : index
    %14 = vector.load %arg5[%c0_11, %c0_12] : memref<32x4xf32, #tpu.memory_space<vmem>>, vector<32x4xf32>
    %cst_13 = arith.constant dense<0.000000e+00> : vector<1x4xf32>
    %15 = tpu.matmul %13, %14, %cst_13 {dimension_numbers = #tpu.dot_dimension_numbers<[1], [0], [0], [1], [0, 0, 1, 1], [], []>} : vector<1x32xf32>, vector<32x4xf32>, vector<1x4xf32> -> vector<1x4xf32>
    %c0_14 = arith.constant 0 : index
    %c0_15 = arith.constant 0 : index
    %16 = vector.load %arg6[%c0_14, %c0_15] : memref<1x4xf32, #tpu.memory_space<vmem>>, vector<1x4xf32>
    %17 = arith.addf %15, %16 : vector<1x4xf32>
    %18 = arith.negf %17 : vector<1x4xf32>
    %19 = math.exp %18 : vector<1x4xf32>
    %cst_16 = arith.constant 1.000000e+00 : f32
    %20 = vector.broadcast %cst_16 : f32 to vector<1x4xf32>
    %21 = arith.addf %20, %19 : vector<1x4xf32>
    %22 = arith.divf %20, %21 : vector<1x4xf32>
    %c0_17 = arith.constant 0 : index
    %c0_18 = arith.constant 0 : index
    %c0_19 = arith.constant 0 : index
    %23 = vector.load %arg1[%c0_17, %c0_18, %c0_19] : memref<1x4x16xf32, #tpu.memory_space<vmem>>, vector<1x4x16xf32>
    %24 = vector.shape_cast %22 : vector<1x4xf32> to vector<1x4x1xf32>
    %25 = vector.broadcast %24 : vector<1x4x1xf32> to vector<1x4x16xf32>
    %26 = arith.mulf %23, %25 : vector<1x4x16xf32>
    %c0_20 = arith.constant 0 : index
    %c0_21 = arith.constant 0 : index
    %c0_22 = arith.constant 0 : index
    %27 = vector.load %arg7[%c0_20, %c0_21, %c0_22] : memref<1x4x16xf32, #tpu.memory_space<vmem>>, vector<1x4x16xf32>
    tpu.vector_store %arg7[%c0_20, %c0_21, %c0_22], %26 {strides = array<i32>} : memref<1x4x16xf32, #tpu.memory_space<vmem>>, vector<1x4x16xf32>,
    return
  }
  func.func @transform_0(%arg0: i32) -> (i32, i32, i32) {
    %c0_i32 = arith.constant 0 : i32
    %c0_i32_0 = arith.constant 0 : i32
    %c0_i32_1 = arith.constant 0 : i32
    return %arg0, %c0_i32, %c0_i32_0 : i32, i32, i32
  }
  func.func @transform_1(%arg0: i32) -> (i32, i32) {
    %c0_i32 = arith.constant 0 : i32
    %c0_i32_0 = arith.constant 0 : i32
    %c0_i32_1 = arith.constant 0 : i32
    return %c0_i32, %c0_i32_0 : i32, i32
  }
  func.func @transform_2(%arg0: i32) -> (i32, i32) {
    %c0_i32 = arith.constant 0 : i32
    %c0_i32_0 = arith.constant 0 : i32
    %c0_i32_1 = arith.constant 0 : i32
    return %c0_i32, %c0_i32_0 : i32, i32
  }
  func.func @transform_3(%arg0: i32) -> (i32, i32) {
    %c0_i32 = arith.constant 0 : i32
    %c0_i32_0 = arith.constant 0 : i32
    %c0_i32_1 = arith.constant 0 : i32
    return %c0_i32, %c0_i32_0 : i32, i32
  }
  func.func @transform_4(%arg0: i32) -> (i32, i32) {
    %c0_i32 = arith.constant 0 : i32
    %c0_i32_0 = arith.constant 0 : i32
    %c0_i32_1 = arith.constant 0 : i32
    return %c0_i32, %c0_i32_0 : i32, i32
  }
  func.func @transform_5(%arg0: i32) -> (i32, i32) {
    %c0_i32 = arith.constant 0 : i32
    %c0_i32_0 = arith.constant 0 : i32
    %c0_i32_1 = arith.constant 0 : i32
    return %c0_i32, %c0_i32_0 : i32, i32
  }
  func.func @transform_6(%arg0: i32) -> (i32, i32, i32) {
    %c0_i32 = arith.constant 0 : i32
    %c0_i32_0 = arith.constant 0 : i32
    %c0_i32_1 = arith.constant 0 : i32
    return %arg0, %c0_i32, %c0_i32_0 : i32, i32, i32
  }
}

</mosaic_0001>

<bundles_post_ra>
// kernel: tpu_custom_call.1
= control target key start
LH: loop header
LB: loop body
LE: loop exit
PB: predicated region body
PF: predicated region fallthrough
CT: control target
= control target key end

     0   :  { %s808_s0 = inlined_call_operand.vmem [shape: f32[2,4,16], index: 0, kind: input, shape index: {}]   ;;  %s809_s1 = inlined_call_operand.vmem [shape: f32[4,32], index: 1, kind: input, shape index: {}]   ;;  %s810_s2 = inlined_call_operand.vmem [shape: f32[1,32], index: 2, kind: input, shape index: {}]   ;;  %s811_s3 = inlined_call_operand.<no memory space> [shape: f32[1,1], index: 3, kind: input, shape index: {}]   ;;  %s812_s4 = inlined_call_operand.vmem [shape: f32[32,4], index: 4, kind: input, shape index: {}]   ;;  %s813_s5 = inlined_call_operand.vmem [shape: f32[1,4], index: 5, kind: input, shape index: {}]   ;;  %s814_s6 = inlined_call_operand.hbm [shape: f32[2,4,16], index: 6, kind: output, shape index: {}]  }
   0x1   :  { %11 = sst [smem:[#allocation2]] %s811_s3 }
   0x2   :  { %12 = vsyncpa [#allocation4], 0 }
   0x3   :  { %14 = vsyncpa [#allocation4 + $0x1], 0  ;;  %s698_s23 = smov 0   ;;  %s700_s24 = smov 0  }
   0x4   :  { %s702_s25 = smov 0   ;;  %s704_s26 = smov 0  }
   0x5 LB: > { %s719_s3 = sadd.s32 4294967295, %s655_s26   ;;  %s513_s27 = sadd.s32 4294967294, %s655_s26   ;;  %s655_s26 = sphi %s704_s26, %s820_s26   ;;  %s651_s25 = sphi %s702_s25, %s819_s25   ;;  %s647_s24 = sphi %s700_s24, %s818_s24   ;;  %s643_s23 = sphi %s698_s23, %s817_s23  }
   0x6   : > { %s723_s28 = sadd.s32 1, %s655_s26   ;;  %s158_s29 = sadd.s32 1, %s651_s25 }
   0x7   : > { %s155_s30 = ssub.s32 %s655_s26, %s723_s28  ;;  %p168_p0 = scmp.ne.s32.totalorder %s651_s25, %s647_s24 }
   0x8   : > { %p156_p1 = scmp.eq.s32.totalorder %s155_s30, 0  ;;  %p169_p2 = scmp.eq.s32.totalorder %s719_s3, 1 }
   0x9   : > { %p174_p3 = scmp.ne.s32.totalorder %s647_s24, %s643_s23  ;;  %p175_p4 = scmp.eq.s32.totalorder %s513_s27, 1 }
   0xa   : > { %s734_s7 = scalar_select %p156_p1, %s651_s25, %s158_s29  }
   0xb   : > { %p736_p5 = por %p169_p2, %p168_p0  ;;  %p740_p6 = por %p175_p4, %p174_p3 }
   0xc   : > { %p516_p7 = scmp.ge.s32.totalorder %s655_s26, 1  ;;  %p215_p8 = scmp.lt.s32.totalorder %s655_s26, 3 }
   0xe   : > { %p216_p9 = pnand %p516_p7, %p215_p8 }
   0xf   : > { %p244_p10 = scmp.lt.s32.totalorder (!%p216_p9), %s719_s3, 1  ;;  %s341_s30 = sld [smem:[#allocation2]] (!%p216_p9) }
  0x10   : > { %219 = sbr.rel (%p216_p9) target bundleno = 726 (0x2d6), region = 44  ;;  %s524_s16 = sshll.u32 (!%p216_p9), %s719_s3, 6 }
  0x11   : > { %s452_s21 = scalar_lea.hbm (!%p216_p9), %s814_s6, %s524_s16  ;;  %s659_s29 = smov (!%p216_p9), [#allocation3]  }
  0x15   : > { %s245_s10 = scalar_select %p244_p10, %s719_s3, 1  ;;  %vm249_vm0 = vcmask 125952   ;;  %v657_v2 = vmov 0.0   ;;  %v255_v3 = vld [vmem:[%s809_s1] sm:$0xf]  ;;  %vm267_vm1 = vcmask 1043456   ;;  %v258_v5 = vlaneseq }
  0x16   : > { %534 = vmatprep.subr.mxu0 %v657_v2  ;;  %539 = vmatprep.subr.mxu1 %v657_v2  ;;  %vm658_vm2 = vmmov 0   ;;  %v349_v4 = vld [vmem:[%s812_s4 + $0x18] sm:$0xff]  ;;  %vm264_vm3 = vcmask 31744   ;;  %v348_v12 = vld [vmem:[%s812_s4 + $0x10] sm:$0xff]  ;;  %v347_v13 = vld [vmem:[%s812_s4 + $0x8] sm:$0xff]  ;;  %v343_v17 = vstv %s341_s30  ;;  %vm351_vm5 = vcmask 261120  }
  0x17   : > { %s518_s11 = sshll.u32 %s245_s10, 2  ;;  %535 = vmatpush3.msk.msra.mxu0 %vm267_vm1, %v255_v3  ;;  %536 = vmatprep.mubr.msk.f32.mxu0 %vm658_vm2, %v657_v2  ;;  %v259_v6 = vand.u32 127, %v258_v5  ;;  %v261_v7 = vshrl.u32 %v258_v5, 7  ;;  %v346_v14 = vld [vmem:[%s812_s4] sm:$0xff]  ;;  %s599_s30 = sshll.u32 %s659_s29, 4  ;;  %s600_s30 = int_to_ptr.vmem [resolvable:$false] %s599_s30 }
  0x18   : > { %s247_s14 = scalar_lea.vmem %s808_s0, %s518_s11  ;;  %547 = vmatprep.mubr.msk.f32.mxu1 %vm658_vm2, %v657_v2  ;;  %540 = vmatpush3.msra.mxu1 %v349_v4  ;;  %v256_v15 = vld [vmem:[%s810_s2] sm:$0x1]  ;;  %s601_s3 = scalar_lea.vmem %s600_s30, 128 }
  0x19   : > { %v248_v0 = vld [vmem:[%s247_s14] sm:$0xf]  ;;  %541 = vmatprep.subr.mxu1 %v657_v2  ;;  %v262_v8 = vsub.s32 %v259_v6, %v261_v7  ;;  %v433_v29 = vsub.s32 0, %v261_v7  ;;  %s241_s14 = sand.u32 1, %s647_s24  }
  0x1a   : > { %v250_v1 = vsel %vm249_vm0, %v248_v0, 0.0  ;;  %542 = vmatpush3.msra.mxu1 %v348_v12  ;;  %v350_v22 = vld [vmem:[%s813_s5] sm:$0x1]  ;;  %s517_s15 = sshll.u32 %s241_s14, 2  ;;  %s441_s22 = scalar_lea.sflag [#allocation4], %s241_s14 }
  0x1b   : > { %251 = vadd.xlane.f32.xlu0 %v250_v1  ;;  %543 = vmatprep.subr.mxu1 %v657_v2  ;;  %s243_s17 = scalar_lea.vmem [#allocation3], %s517_s15 }
  0x1c   : > { %544 = vmatpush3.msra.mxu1 %v347_v13  ;;  %s454_s18 = sshll.u32 %s243_s17, 4  ;;  %s455_s18 = int_to_ptr.vmem [resolvable:$true] %s454_s18 }
  0x1d   : > { %545 = vmatprep.subr.mxu1 %v657_v2  ;;  %s595_s27 = scalar_lea.vmem %s455_s18, 64  ;;  %p602_p0 = scmp.lt.s32.totalorder %s455_s18, %s600_s30 }
  0x1e   : > { %546 = vmatpush3.msra.mxu1 %v346_v14  ;;  %p596_p11 = scmp.ne.s32.totalorder %s455_s18, %s595_s27  ;;  %p603_p1 = scmp.lt.s32.totalorder %s601_s3, %s595_s27 }
  0x20   : > { %p597_p12 = pnand %p596_p11, %p736_p5  ;;  %p604_p2 = por %p603_p1, %p602_p0 }
  0x22   : > { %p598_p13 = pneg %p597_p12 }
  0x24   : > { %p605_p3 = pnand %p604_p2, %p598_p13 }
  0xa4   : > { %v252_v9 = vpop.xlane.xlu0 %251 }
  0xa5   : > { %v254_v10 = vmul.f32 0.0625, %v252_v9 }
  0xa7   : > { %v263_v11 = vrot.slane %v254_v10, %v262_v8 }
  0xa9   : > { %537 = vmatmul.mubr.msk.f32.vlgmr.msra.gmra.mxu0 %vm264_vm3, %v263_v11 }
 0x169   : > { %v337_v16 = vpop.f32.mrf.mxu0 }
 0x16a   : > { %v338_v18 = vadd.f32 %v337_v16, %v256_v15 }
 0x16b   : > { %v538_v19 = vpop.f32.mrf.mxu0 }
 0x16c   : > { %vm342_vm4 = vcmp.ge.f32.partialorder %v338_v18, 0.0  ;;  %v344_v20 = vmul.f32 %v343_v17, %v338_v18 }
 0x16e   : > { %v345_v21 = vsel %vm342_vm4, %v338_v18, %v344_v20 }
 0x16f   : > { %548 = vmatmul.mubr.msk.f32.vlgmr.msra.gmra.mxu1 %vm351_vm5, %v345_v21 }
 0x22f   : > { %v421_v23 = vpop.f32.mrf.mxu1 }
 0x230   : > { %v422_v24 = vadd.f32 %v421_v23, %v350_v22 }
 0x231   : > { %v549_v25 = vpop.f32.mrf.mxu1 }
 0x232   : > { %v522_v26 = vmul.f32 -1.442695, %v422_v24 }
 0x234   : > { %591 = vpow2.f32 %v522_v26 }
 0x241   : > { %v592_v27 = vpop.eup %591 }
 0x242   : > { %v428_v28 = vadd.f32 1.0, %v592_v27 }
 0x244   : > { %593 = vrcp.f32 %v428_v28 }
 0x251   : > { %v594_v30 = vpop.eup %593 }
 0x252   : > { %v434_v31 = vrot.slane %v594_v30, %v433_v29 }
 0x254   : > { %436 = vbcast.lane.b32.xlu0 %v434_v31, 256 }
 0x2c6   : > { %v437_v32 = vpop.permute.xlu0 %436 }
 0x2c7   : > { %v438_v33 = vmul.f32 %v437_v32, %v248_v0 }
 0x2c9   : > { %439 = vst.msk [vmem:[%s243_s17] sm:$0xf] %vm249_vm0, %v438_v33 }
 0x2ca   : > { %608 = shalt.err (!%p605_p3)
}
 0x2cb   : > { %s609_s10 = scalar_lea.hbm %s452_s21, 64  ;;  %s613_s13 = scalar_lea.hbm %s814_s6, 128 }
 0x2cc   : > { %p610_p4 = scmp.ne.s32.totalorder %s452_s21, %s609_s10  ;;  %p614_p9 = scmp.lt.s32.totalorder %s452_s21, %s814_s6 }
 0x2cd   : > { %p615_p10 = scmp.lt.s32.totalorder %s613_s13, %s609_s10 }
 0x2ce   : > { %p611_p7 = pnand %p610_p4, %p736_p5 }
 0x2cf   : > { %p616_p11 = por %p615_p10, %p614_p9 }
 0x2d0   : > { %p612_p8 = pneg %p611_p7 }
 0x2d2   : > { %p617_p12 = pnand %p616_p11, %p612_p8 }
 0x2d4   : > { %620 = shalt.err (!%p617_p12)
}
 0x2d5   : > { %550 = dma.vmem_to_hbm [thread:$0]  (%p736_p5), %s455_s18, 64, %s452_s21, %s441_s22  }
 0x2d6 PF: > { %p556_p13 = scmp.ge.s32.totalorder %s655_s26, 2  ;;  %s466_s16 = sand.u32 1, %s643_s23  }
 0x2d7   : > { %s467_s17 = scalar_lea.sflag [#allocation4], %s466_s16 }
 0x2d8   : > { %p553_p0 = pnand %p556_p13, %p740_p6 }
 0x2da   : > { %p554_p1 = pneg %p553_p0 }
 0x2dc   : > { %638 = dma.done.wait (%p554_p1), %s467_s17, 64  }
 0x2dd   : > { %640 = vsyncadd (%p554_p1), %s467_s17, 4294967232  ;;  %p17_p2 = scmp.ge.s32.totalorder %s723_s28, 4   ;;  %s817_s23 = smov %s647_s24 }
 0x2de   : > { %s818_s24 = smov %s651_s25  ;;  %s819_s25 = smov %s734_s7 }
 0x2df   : > { %s820_s26 = smov %s723_s28  ;;  %19 = sbr.rel (!%p17_p2) target bundleno = 5 (0x5), region = 79 }
 0x2e4   :  { %472 = vsyncpa [#allocation4], 1 }
 0x2e5   :  { %474 = vsyncpa [#allocation4 + $0x1], 1 }

</bundles_post_ra>
